<compile_context>
chip_gen: v5e
topology: v5e:2x2
jax: 0.10.0
libtpu: 0.0.40
codegen_flags: <defaults>
</compile_context>

<pallas_src>
import numpy as np
import jax
import jax.numpy as jnp
from jax.experimental import pallas as pl
from jax.experimental.pallas import tpu as pltpu


def _fixed_matrices():
    A = np.array([-1.0, 0.5, 1.0, 0.5, 2.0, 2.0], dtype=np.float64).reshape(3, 2)
    cof = (np.linalg.inv(A.T @ A) @ A.T).astype(np.float32)      # (2, 3)
    u = np.cross(A[:, 0], A[:, 1])
    u = u / np.linalg.norm(u)                                    # unit normal to col(A)
    return A.astype(np.float32), cof, u


def make_lse_kernel():
    _, cof, u = _fixed_matrices()
    c00, c01, c02 = (float(x) for x in cof[0])
    c10, c11, c12 = (float(x) for x in cof[1])
    # error = (u.b)^2 / 3 ; fold the 1/3 into the direction: w = u / sqrt(3)
    w0, w1, w2 = (float(x) for x in (u / np.sqrt(3.0)))

    def lse_kernel(f1_ref, f2_ref, f3_ref, v0_ref, acc_ref, err_ref):
        f1 = f1_ref[...]
        f2 = f2_ref[...]
        f3 = f3_ref[...]
        # result = cof @ b
        v0_ref[...] = c00 * f1 + c01 * f2 + c02 * f3
        acc_ref[...] = c10 * f1 + c11 * f2 + c12 * f3
        # error = mean_i ((A @ result - b)_i^2) == (w . b)^2
        r = w0 * f1 + w1 * f2 + w2 * f3
        err_ref[...] = r * r

    return lse_kernel


_LSE_KERNEL = make_lse_kernel()

_TARGET_TILE_BYTES = 2 << 20   # ~2 MiB per array per grid step (f32)
_LANES_CAP = 4096              # lane-dense blocks, simple reshape
_MIN_GRID = 4                  # enough grid steps for both v7x TensorCores


def _choose_layout(N):
    """Return (lanes, n_flat). lanes is a multiple of 128; zero padding
    whenever a suitable divisor of N exists (always true if N % 128 == 0)."""
    cap = min(_LANES_CAP, (N // 128) * 128)
    for lanes in range(cap, 127, -128):
        if N % lanes == 0:
            return lanes, N                     # exact — no pad/unpad copies
    lanes = 1024                                # fallback: N % 128 != 0
    return lanes, pl.cdiv(N, lanes) * lanes


def _lse_forward(f1, f2, f3):
    """Returns (v0, acc, error), each [B, H, W] float32."""
    B, H, W = f1.shape
    N = B * H * W

    lanes, n_flat = _choose_layout(N)
    rows = n_flat // lanes

    # ~2 MiB tiles, multiple of 8 rows; cap so grid >= _MIN_GRID when possible.
    tile_rows = max(8, (_TARGET_TILE_BYTES // (4 * lanes)) // 8 * 8)
    grid_cap = (rows // _MIN_GRID) // 8 * 8
    if grid_cap >= 8:
        tile_rows = min(tile_rows, grid_cap)
    if tile_rows >= rows:
        tile_rows = rows                        # single block = full array

    def to2d(x):
        x = x.reshape(-1).astype(jnp.float32)
        if n_flat != N:                         # rare fallback only
            x = jnp.pad(x, (0, n_flat - N))
        return x.reshape(rows, lanes)

    f1p, f2p, f3p = to2d(f1), to2d(f2), to2d(f3)

    grid = (pl.cdiv(rows, tile_rows),)          # ragged tail block is masked by Pallas
    spec = pl.BlockSpec((tile_rows, lanes), lambda i: (i, 0))
    out_shape = tuple(
        jax.ShapeDtypeStruct((rows, lanes), jnp.float32) for _ in range(3)
    )

    v0p, accp, errp = pl.pallas_call(
        _LSE_KERNEL,
        out_shape=out_shape,
        grid=grid,
        in_specs=[spec, spec, spec],
        out_specs=(spec, spec, spec),
        compiler_params=pltpu.CompilerParams(
            dimension_semantics=("parallel",),
            vmem_limit_bytes=48 << 20,          # safe on v5e/v6e/v7x; ~24 MiB actually used
        ),
    )(f1p, f2p, f3p)

    def from2d(y):
        y = y.reshape(-1)
        if n_flat != N:
            y = y[:N]
        return y.reshape(B, H, W)

    return from2d(v0p), from2d(accp), from2d(errp)


lse_acceleration_solver = jax.jit(_lse_forward)


def _reference(f1, f2, f3):
    # Pure-JAX reference replicating the PyTorch forward (high precision matmuls).
    B, H, W = f1.shape
    A_np, cof_np, _ = _fixed_matrices()
    A = jnp.asarray(A_np)
    cof = jnp.asarray(cof_np)
    b = jnp.stack(
        [f1.reshape(B, -1), f2.reshape(B, -1), f3.reshape(B, -1)], axis=1
    )  # (B, 3, N)
    hp = jax.lax.Precision.HIGHEST
    result = jnp.einsum("ij,bjn->bin", cof, b, precision=hp)     # (B, 2, N)
    invers = jnp.einsum("ij,bjn->bin", A, result, precision=hp)  # (B, 3, N)
    error = jnp.mean((invers - b) ** 2, axis=1).reshape(B, H, W)
    v0 = result[:, 0, :].reshape(B, H, W)
    acc = result[:, 1, :].reshape(B, H, W)
    return v0, acc, error


if __name__ == "__main__":
    # Primary small test: N % 128 == 0 -> zero-copy layout path.
    k1, k2, k3 = jax.random.split(jax.random.PRNGKey(0), 3)
    B, H, W = 2, 16, 16
    f1 = jax.random.normal(k1, (B, H, W), dtype=jnp.float32)
    f2 = jax.random.normal(k2, (B, H, W), dtype=jnp.float32)
    f3 = jax.random.normal(k3, (B, H, W), dtype=jnp.float32)

    v0, acc, err = lse_acceleration_solver(f1, f2, f3)
    jax.block_until_ready((v0, acc, err))

    rv0, racc, rerr = _reference(f1, f2, f3)
    np.testing.assert_allclose(np.asarray(v0), np.asarray(rv0), rtol=1e-5, atol=1e-5)
    np.testing.assert_allclose(np.asarray(acc), np.asarray(racc), rtol=1e-5, atol=1e-5)
    np.testing.assert_allclose(np.asarray(err), np.asarray(rerr), rtol=1e-5, atol=1e-5)

    # Secondary: odd shape (N % 128 != 0) exercises the padded fallback path.
    k4, k5, k6 = jax.random.split(jax.random.PRNGKey(1), 3)
    g1 = jax.random.normal(k4, (2, 17, 19), dtype=jnp.float32)
    g2 = jax.random.normal(k5, (2, 17, 19), dtype=jnp.float32)
    g3 = jax.random.normal(k6, (2, 17, 19), dtype=jnp.float32)
    gv0, gacc, gerr = lse_acceleration_solver(g1, g2, g3)
    jax.block_until_ready((gv0, gacc, gerr))
    rg0, rgacc, rgerr = _reference(g1, g2, g3)
    np.testing.assert_allclose(np.asarray(gv0), np.asarray(rg0), rtol=1e-5, atol=1e-5)
    np.testing.assert_allclose(np.asarray(gacc), np.asarray(rgacc), rtol=1e-5, atol=1e-5)
    np.testing.assert_allclose(np.asarray(gerr), np.asarray(rgerr), rtol=1e-5, atol=1e-5)

    print("KERNEL_OK")
</pallas_src>

<mosaic_0001>
module attributes {stable_mosaic.version = 11 : i64} {
  func.func @lse_kernel(%arg0: i32, %arg1: memref<1x512xf32, #tpu.memory_space<vmem>>, %arg2: memref<1x512xf32, #tpu.memory_space<vmem>>, %arg3: memref<1x512xf32, #tpu.memory_space<vmem>>, %arg4: memref<1x512xf32, #tpu.memory_space<vmem>>, %arg5: memref<1x512xf32, #tpu.memory_space<vmem>>, %arg6: memref<1x512xf32, #tpu.memory_space<vmem>>) attributes {dimension_semantics = [#tpu.dimension_semantics<parallel>], iteration_bounds = array<i64: 1>, scalar_prefetch = 0 : i64, scratch_operands = 0 : i64, tpu.core_type = #tpu.core_type<tc>, window_params = [{transform_indices = @transform_0, window_bounds = array<i64: 1, 512>}, {transform_indices = @transform_1, window_bounds = array<i64: 1, 512>}, {transform_indices = @transform_2, window_bounds = array<i64: 1, 512>}, {transform_indices = @transform_3, window_bounds = array<i64: 1, 512>}, {transform_indices = @transform_4, window_bounds = array<i64: 1, 512>}, {transform_indices = @transform_5, window_bounds = array<i64: 1, 512>}]} {
    %c0 = arith.constant 0 : index
    %c0_0 = arith.constant 0 : index
    %0 = vector.load %arg1[%c0, %c0_0] : memref<1x512xf32, #tpu.memory_space<vmem>>, vector<1x512xf32>
    %c0_1 = arith.constant 0 : index
    %c0_2 = arith.constant 0 : index
    %1 = vector.load %arg2[%c0_1, %c0_2] : memref<1x512xf32, #tpu.memory_space<vmem>>, vector<1x512xf32>
    %c0_3 = arith.constant 0 : index
    %c0_4 = arith.constant 0 : index
    %2 = vector.load %arg3[%c0_3, %c0_4] : memref<1x512xf32, #tpu.memory_space<vmem>>, vector<1x512xf32>
    %cst = arith.constant -0.590909064 : f32
    %3 = vector.broadcast %cst : f32 to vector<1x512xf32>
    %4 = arith.mulf %3, %0 : vector<1x512xf32>
    %cst_5 = arith.constant 0.227272734 : f32
    %5 = vector.broadcast %cst_5 : f32 to vector<1x512xf32>
    %6 = arith.mulf %5, %1 : vector<1x512xf32>
    %7 = arith.addf %4, %6 : vector<1x512xf32>
    %cst_6 = arith.constant 0.0909090936 : f32
    %8 = vector.broadcast %cst_6 : f32 to vector<1x512xf32>
    %9 = arith.mulf %8, %2 : vector<1x512xf32>
    %10 = arith.addf %7, %9 : vector<1x512xf32>
    %c0_7 = arith.constant 0 : index
    %c0_8 = arith.constant 0 : index
    %11 = vector.load %arg4[%c0_7, %c0_8] : memref<1x512xf32, #tpu.memory_space<vmem>>, vector<1x512xf32>
    tpu.vector_store %arg4[%c0_7, %c0_8], %10 {strides = array<i32>} : memref<1x512xf32, #tpu.memory_space<vmem>>, vector<1x512xf32>,
    %cst_9 = arith.constant 0.636363626 : f32
    %12 = vector.broadcast %cst_9 : f32 to vector<1x512xf32>
    %13 = arith.mulf %12, %0 : vector<1x512xf32>
    %cst_10 = arith.constant -0.0909090936 : f32
    %14 = vector.broadcast %cst_10 : f32 to vector<1x512xf32>
    %15 = arith.mulf %14, %1 : vector<1x512xf32>
    %16 = arith.addf %13, %15 : vector<1x512xf32>
    %cst_11 = arith.constant 0.363636374 : f32
    %17 = vector.broadcast %cst_11 : f32 to vector<1x512xf32>
    %18 = arith.mulf %17, %2 : vector<1x512xf32>
    %19 = arith.addf %16, %18 : vector<1x512xf32>
    %c0_12 = arith.constant 0 : index
    %c0_13 = arith.constant 0 : index
    %20 = vector.load %arg5[%c0_12, %c0_13] : memref<1x512xf32, #tpu.memory_space<vmem>>, vector<1x512xf32>
    tpu.vector_store %arg5[%c0_12, %c0_13], %19 {strides = array<i32>} : memref<1x512xf32, #tpu.memory_space<vmem>>, vector<1x512xf32>,
    %cst_14 = arith.constant 0.17407766 : f32
    %21 = vector.broadcast %cst_14 : f32 to vector<1x512xf32>
    %22 = arith.mulf %21, %0 : vector<1x512xf32>
    %cst_15 = arith.constant 0.52223295 : f32
    %23 = vector.broadcast %cst_15 : f32 to vector<1x512xf32>
    %24 = arith.mulf %23, %1 : vector<1x512xf32>
    %25 = arith.addf %22, %24 : vector<1x512xf32>
    %cst_16 = arith.constant -0.17407766 : f32
    %26 = vector.broadcast %cst_16 : f32 to vector<1x512xf32>
    %27 = arith.mulf %26, %2 : vector<1x512xf32>
    %28 = arith.addf %25, %27 : vector<1x512xf32>
    %29 = arith.mulf %28, %28 : vector<1x512xf32>
    %c0_17 = arith.constant 0 : index
    %c0_18 = arith.constant 0 : index
    %30 = vector.load %arg6[%c0_17, %c0_18] : memref<1x512xf32, #tpu.memory_space<vmem>>, vector<1x512xf32>
    tpu.vector_store %arg6[%c0_17, %c0_18], %29 {strides = array<i32>} : memref<1x512xf32, #tpu.memory_space<vmem>>, vector<1x512xf32>,
    return
  }
  func.func @transform_0(%arg0: i32) -> (i32, i32) {
    %c0_i32 = arith.constant 0 : i32
    %c0_i32_0 = arith.constant 0 : i32
    return %arg0, %c0_i32 : i32, i32
  }
  func.func @transform_1(%arg0: i32) -> (i32, i32) {
    %c0_i32 = arith.constant 0 : i32
    %c0_i32_0 = arith.constant 0 : i32
    return %arg0, %c0_i32 : i32, i32
  }
  func.func @transform_2(%arg0: i32) -> (i32, i32) {
    %c0_i32 = arith.constant 0 : i32
    %c0_i32_0 = arith.constant 0 : i32
    return %arg0, %c0_i32 : i32, i32
  }
  func.func @transform_3(%arg0: i32) -> (i32, i32) {
    %c0_i32 = arith.constant 0 : i32
    %c0_i32_0 = arith.constant 0 : i32
    return %arg0, %c0_i32 : i32, i32
  }
  func.func @transform_4(%arg0: i32) -> (i32, i32) {
    %c0_i32 = arith.constant 0 : i32
    %c0_i32_0 = arith.constant 0 : i32
    return %arg0, %c0_i32 : i32, i32
  }
  func.func @transform_5(%arg0: i32) -> (i32, i32) {
    %c0_i32 = arith.constant 0 : i32
    %c0_i32_0 = arith.constant 0 : i32
    return %arg0, %c0_i32 : i32, i32
  }
}

</mosaic_0001>

<bundles_post_ra>
// kernel: _lse_forward.1
= control target key start
LH: loop header
LB: loop body
LE: loop exit
PB: predicated region body
PF: predicated region fallthrough
CT: control target
= control target key end

     0   :  { %v25_v3 = vlaneseq  ;;  %s103_s0 = inlined_call_operand.vmem [shape: f32[1,512], index: 0, kind: input, shape index: {}]   ;;  %s104_s1 = inlined_call_operand.vmem [shape: f32[1,512], index: 1, kind: input, shape index: {}]   ;;  %s105_s2 = inlined_call_operand.vmem [shape: f32[1,512], index: 2, kind: input, shape index: {}]   ;;  %s106_s3 = inlined_call_operand.vmem [shape: f32[1,512], index: 3, kind: output, shape index: {0}]   ;;  %s107_s4 = inlined_call_operand.vmem [shape: f32[1,512], index: 4, kind: output, shape index: {1}]   ;;  %s108_s5 = inlined_call_operand.vmem [shape: f32[1,512], index: 5, kind: output, shape index: {2}]  }
   0x1   :  { %v17_v0 = vld [vmem:[%s103_s0] sm:$0xf] }
   0x2   :  { %v18_v1 = vld [vmem:[%s104_s1] sm:$0xf]  ;;  %v20_v4 = vmul.f32 -0.59090906, %v17_v0  ;;  %v30_v7 = vmul.f32 0.6363636, %v17_v0 }
   0x3   :  { %v19_v2 = vld [vmem:[%s105_s2] sm:$0xf]  ;;  %v21_v5 = vmul.f32 0.22727273, %v18_v1  ;;  %v31_v8 = vmul.f32 -0.09090909, %v18_v1 }
   0x4   :  { %v23_v6 = vmul.f32 0.09090909, %v19_v2  ;;  %v33_v10 = vmul.f32 0.36363637, %v19_v2  ;;  %v36_v11 = vmul.f32 0.17407766, %v17_v0 }
   0x5   :  { %v22_v9 = vadd.f32 %v21_v5, %v20_v4  ;;  %v37_v12 = vmul.f32 0.52223295, %v18_v1  ;;  %vm27_vm0 = vcmp.lt.s32.totalorder %v25_v3, 512  ;;  %v32_v13 = vadd.f32 %v31_v8, %v30_v7 }
   0x6   :  { %v39_v14 = vmul.f32 -0.17407766, %v19_v2 }
   0x7   :  { %v24_v15 = vadd.f32 %v23_v6, %v22_v9  ;;  %v38_v16 = vadd.f32 %v37_v12, %v36_v11  ;;  %v34_v17 = vadd.f32 %v33_v10, %v32_v13 }
   0x9   :  { %29 = vst.msk [vmem:[%s106_s3] sm:$0xf] %vm27_vm0, %v24_v15  ;;  %v40_v18 = vadd.f32 %v39_v14, %v38_v16 }
   0xa   :  { %35 = vst.msk [vmem:[%s107_s4] sm:$0xf] %vm27_vm0, %v34_v17 }
   0xb   :  { %v41_v19 = vmul.f32 %v40_v18, %v40_v18 }
   0xd   :  { %42 = vst.msk [vmem:[%s108_s5] sm:$0xf] %vm27_vm0, %v41_v19 }

</bundles_post_ra>
